<compile_context>
chip_gen: v5e
topology: v5e:2x2
jax: 0.10.0
libtpu: 0.0.40
codegen_flags: <defaults>
</compile_context>

<pallas_src>
import functools

import jax
import jax.numpy as jnp
import numpy as np
from jax.experimental import pallas as pl
from jax.experimental.pallas import tpu as pltpu

EPS = 1e-6


# --------------------------------------------------------------------------- #
# Shared in-kernel math
# --------------------------------------------------------------------------- #
def _rational(xn, num_ref, den_ref, degree, exact_divide):
    """era_function: linear term + partial fractions (statically unrolled)."""
    out = num_ref[0] * xn + num_ref[1]
    for i in range(degree // 2):
        a = num_ref[2 + 2 * i]
        b = num_ref[3 + 2 * i]
        p = den_ref[2 * i]
        q = den_ref[2 * i + 1]
        t = xn - p
        den = t * t + (q * q + EPS)          # q*q + EPS folds to one SMEM scalar
        if exact_divide:
            out = out + (a * xn + b) / den
        else:
            # EUP approx reciprocal (free slot) + one Newton step -> ~f32 accurate.
            r = pl.reciprocal(den, approx=True)
            r = r * (2.0 - den * r)
            out = out + (a * xn + b) * r
    return out


def _era_kernel_nchw(x_ref, beta_ref, gamma_ref, num_ref, den_ref, o_ref, *,
                     degree, exact_divide):
    """4-D path: x_ref (Nb, C, H, TW); standardization over (C, H) per (n, w)."""
    x = x_ref[...].astype(jnp.float32)
    c, h = x.shape[1], x.shape[2]
    n_red = c * h
    inv_n = 1.0 / n_red
    inv_nm1 = 1.0 / max(n_red - 1, 1)   # NOTE: torch.std(ddof=1) would be NaN at C*H==1

    # One-pass stats (sum / sum-of-squares).
    # TODO(synk): switch to a centered second pass if |mean| >> std per column
    # ever pushes the sum-of-squares variance below rtol=1e-4 accuracy.
    s1 = jnp.sum(x, axis=(1, 2), keepdims=True)          # (Nb,1,1,TW)
    s2 = jnp.sum(x * x, axis=(1, 2), keepdims=True)
    mu = s1 * inv_n
    var = jnp.maximum(s2 - s1 * mu, 0.0) * inv_nm1       # unbiased (ddof=1)
    rinv = 1.0 / (jnp.sqrt(var) + EPS)                   # only Nb*TW divides

    # Fold per-channel affine into per-(Nb,C,1,TW) scale/offset: per element the
    # standardization is then a single mul + add instead of sub/mul/mul/add.
    scale = gamma_ref[...] * rinv                        # (Nb,C,1,TW)
    offset = beta_ref[...] - mu * scale                  # (Nb,C,1,TW)
    xn = x * scale + offset

    o_ref[...] = _rational(xn, num_ref, den_ref, degree, exact_divide).astype(o_ref.dtype)


def _era_kernel_rows(x_ref, beta_ref, gamma_ref, num_ref, den_ref, o_ref, *,
                     degree, exact_divide):
    """2-D lane-dense path: x_ref (R, TL), rows R = C*H (reduction), lanes = packed (n, w)."""
    x = x_ref[...].astype(jnp.float32)
    r = x.shape[0]
    inv_n = 1.0 / r
    inv_nm1 = 1.0 / max(r - 1, 1)

    s1 = jnp.sum(x, axis=0, keepdims=True)               # (1, TL)
    s2 = jnp.sum(x * x, axis=0, keepdims=True)
    mu = s1 * inv_n
    var = jnp.maximum(s2 - s1 * mu, 0.0) * inv_nm1
    rinv = 1.0 / (jnp.sqrt(var) + EPS)

    # gamma/beta vary along rows here, so the scale/offset fold would not reduce
    # per-element work; use the direct form.
    xn = beta_ref[...] + gamma_ref[...] * ((x - mu) * rinv)

    o_ref[...] = _rational(xn, num_ref, den_ref, degree, exact_divide).astype(o_ref.dtype)


# --------------------------------------------------------------------------- #
# VMEM accounting / tiling
# --------------------------------------------------------------------------- #
def _vmem_capacity_bytes():
    try:
        return int(pltpu.get_tpu_info().vmem_capacity_bytes)
    except Exception:                       # no TPU info available -> be conservative
        return 64 * 1024 * 1024


def _vmem_limit(blk_elems, itemsize, usable):
    # 2x in + 2x out double-buffers (at input itemsize) + ~3 block-sized f32
    # temporaries the elementwise chain materializes + fixed headroom.
    needed = blk_elems * (4 * itemsize + 12) + (4 << 20)
    return int(min(max(needed, 32 << 20), usable))


def _choose_tiles_nchw(N, C, H, W, itemsize, budget):
    """(nb, tw) for the 4-D path; W is a multiple of 128."""
    row_bytes = C * H * itemsize
    tw = 0
    for cand in range(128, W + 1, 128):
        if W % cand == 0 and cand * row_bytes <= budget:
            tw = cand
    if tw == 0:
        tw = 128                              # minimum lane-dense tile
    blk_bytes = row_bytes * tw
    max_nb = max(1, budget // blk_bytes)
    nb = 1
    for d in range(1, N + 1):
        if N % d == 0 and d <= max_nb:
            nb = d
    # Guarantee >= 2 grid steps when the shape allows (v7x has 2 TensorCores).
    if (N // nb) * (W // tw) == 1:
        if N >= 2:
            nb = max(d for d in range(1, N // 2 + 1) if N % d == 0)
        elif W // 128 >= 2:
            tw = max(c for c in range(128, W // 2 + 1, 128) if W % c == 0)
    return nb, tw


def _choose_tile_rows(R, Lp, itemsize, budget):
    """TL for the 2-D path; Lp is a multiple of 128."""
    row_bytes = R * itemsize
    tl = 128
    for cand in range(128, Lp + 1, 128):
        if Lp % cand == 0 and cand * row_bytes <= budget:
            tl = cand
    if tl == Lp and Lp >= 256:               # keep >= 2 grid steps when possible
        tl = max(c for c in range(128, Lp // 2 + 1, 128) if Lp % c == 0)
    return tl


# --------------------------------------------------------------------------- #
# Wrapper
# --------------------------------------------------------------------------- #
def era_forward(x, beta, gamma, numerator, denominator, *,
                exact_divide=False, block_budget_bytes=None):
    N, C, H, W = x.shape
    degree = int(denominator.shape[0])
    itemsize = jnp.dtype(x.dtype).itemsize

    num = numerator.astype(jnp.float32)
    den = denominator.astype(jnp.float32)

    cap = _vmem_capacity_bytes()
    usable = cap - (12 << 20)                # headroom for compiler-internal scratch
    if block_budget_bytes is None:
        # Budget per block (in input bytes) such that buffers + f32 temps fit:
        # ~6.5 MiB on v7x (64 MiB VMEM), capped at 8 MiB on v5e/v6e (128 MiB).
        per_elem_cost = 4 * itemsize + 12
        auto = (usable - (8 << 20)) * itemsize // per_elem_cost
        block_budget_bytes = int(min(8 << 20, max(2 << 20, auto)))

    kernel_kw = dict(degree=degree, exact_divide=exact_divide)

    if W % 128 == 0:
        # Lane-dense W already: tile (N, W) directly — no wrapper relayout,
        # no extra HBM traffic.
        nb, tw = _choose_tiles_nchw(N, C, H, W, itemsize, block_budget_bytes)
        blk_elems = nb * C * H * tw
        kernel = functools.partial(_era_kernel_nchw, **kernel_kw)
        return pl.pallas_call(
            kernel,
            out_shape=jax.ShapeDtypeStruct((N, C, H, W), x.dtype),
            grid=(N // nb, W // tw),
            in_specs=[
                pl.BlockSpec((nb, C, H, tw), lambda n, w: (n, 0, 0, w)),
                pl.BlockSpec((1, C, 1, 1), lambda n, w: (0, 0, 0, 0)),
                pl.BlockSpec((1, C, 1, 1), lambda n, w: (0, 0, 0, 0)),
                pl.BlockSpec(memory_space=pltpu.MemorySpace.SMEM),
                pl.BlockSpec(memory_space=pltpu.MemorySpace.SMEM),
            ],
            out_specs=pl.BlockSpec((nb, C, H, tw), lambda n, w: (n, 0, 0, w)),
            compiler_params=pltpu.CompilerParams(
                dimension_semantics=("parallel", "parallel"),
                vmem_limit_bytes=_vmem_limit(blk_elems, itemsize, usable)),
        )(x,
          beta.reshape(1, C, 1, 1).astype(jnp.float32),
          gamma.reshape(1, C, 1, 1).astype(jnp.float32),
          num, den)

    # Small / non-128-multiple W: relayout so the lane axis is (N*W) (padded to
    # a multiple of 128 -> unmasked stores, contiguous DMA) and the reduction
    # axis (C*H) becomes rows.  Tensors hitting this path are typically small,
    # so the wrapper-side transpose is cheap layout plumbing.
    R = C * H
    L = N * W
    Lp = ((L + 127) // 128) * 128
    xr = jnp.transpose(x, (1, 2, 0, 3)).reshape(R, L)
    if Lp != L:
        xr = jnp.pad(xr, ((0, 0), (0, Lp - L)))
    gamma_rows = jnp.broadcast_to(
        gamma.reshape(C, 1).astype(jnp.float32), (C, H)).reshape(R, 1)
    beta_rows = jnp.broadcast_to(
        beta.reshape(C, 1).astype(jnp.float32), (C, H)).reshape(R, 1)

    tl = _choose_tile_rows(R, Lp, itemsize, block_budget_bytes)
    blk_elems = R * tl
    kernel = functools.partial(_era_kernel_rows, **kernel_kw)
    out_r = pl.pallas_call(
        kernel,
        out_shape=jax.ShapeDtypeStruct((R, Lp), x.dtype),
        grid=(Lp // tl,),
        in_specs=[
            pl.BlockSpec((R, tl), lambda l: (0, l)),
            pl.BlockSpec((R, 1), lambda l: (0, 0)),
            pl.BlockSpec((R, 1), lambda l: (0, 0)),
            pl.BlockSpec(memory_space=pltpu.MemorySpace.SMEM),
            pl.BlockSpec(memory_space=pltpu.MemorySpace.SMEM),
        ],
        out_specs=pl.BlockSpec((R, tl), lambda l: (0, l)),
        compiler_params=pltpu.CompilerParams(
            dimension_semantics=("parallel",),
            vmem_limit_bytes=_vmem_limit(blk_elems, itemsize, usable)),
    )(xr, beta_rows, gamma_rows, num, den)

    out_r = out_r[:, :L].reshape(C, H, N, W)
    return jnp.transpose(out_r, (2, 0, 1, 3))


# --------------------------------------------------------------------------- #
# Pure-JAX reference (matches the PyTorch module)
# --------------------------------------------------------------------------- #
def era_reference(x, beta, gamma, numerator, denominator):
    mu = jnp.mean(x, axis=(1, 2), keepdims=True)
    sigma = jnp.std(x, axis=(1, 2), keepdims=True, ddof=1)    # torch.std is unbiased
    xn = beta + gamma * (x - mu) / (sigma + EPS)
    out = numerator[0] * xn + numerator[1]
    nw = numerator[2:]
    for i in range(denominator.shape[0] // 2):
        out = out + (nw[2 * i] * xn + nw[2 * i + 1]) / (
            (xn - denominator[2 * i]) ** 2 + denominator[2 * i + 1] ** 2 + EPS)
    return out


if __name__ == "__main__":
    key = jax.random.PRNGKey(0)
    k1, k2 = jax.random.split(key)

    # Shared rational-function parameters (degree_denominator = 4).
    numerator = jnp.array([1.0, 0.1, 0.5, -0.2, 0.3, 0.05], dtype=jnp.float32)
    denominator = jnp.array([0.4, 0.9, -0.3, 0.7], dtype=jnp.float32)

    # ---- test 1: small W=16 -> lane-dense (C*H, N*W) relayout path ----------
    N, C, H, W = 2, 4, 16, 16
    x1 = jax.random.normal(k1, (N, C, H, W), dtype=jnp.float32)
    beta1 = (0.05 * jnp.arange(C, dtype=jnp.float32)).reshape(1, C, 1, 1)
    gamma1 = (1.0 + 0.1 * jnp.arange(C, dtype=jnp.float32)).reshape(1, C, 1, 1)

    out1 = jax.block_until_ready(era_forward(x1, beta1, gamma1, numerator, denominator))
    ref1 = era_reference(x1, beta1, gamma1, numerator, denominator)
    np.testing.assert_allclose(np.asarray(out1), np.asarray(ref1), rtol=1e-4, atol=1e-4)

    # ---- test 2: W multiple of 128, tiny budget to exercise (N, W) tiling ----
    N2, C2, H2, W2 = 2, 8, 8, 256
    x2 = 0.5 + 1.5 * jax.random.normal(k2, (N2, C2, H2, W2), dtype=jnp.float32)
    beta2 = jnp.linspace(-0.3, 0.4, C2, dtype=jnp.float32).reshape(1, C2, 1, 1)
    gamma2 = jnp.linspace(0.8, 1.3, C2, dtype=jnp.float32).reshape(1, C2, 1, 1)

    out2 = jax.block_until_ready(
        era_forward(x2, beta2, gamma2, numerator, denominator,
                    block_budget_bytes=32 * 1024))            # -> grid (2, 2), TW=128
    ref2 = era_reference(x2, beta2, gamma2, numerator, denominator)
    np.testing.assert_allclose(np.asarray(out2), np.asarray(ref2), rtol=1e-4, atol=1e-4)

    # ---- test 3: exact-divide fallback path ----------------------------------
    out3 = jax.block_until_ready(
        era_forward(x1, beta1, gamma1, numerator, denominator, exact_divide=True))
    np.testing.assert_allclose(np.asarray(out3), np.asarray(ref1), rtol=1e-4, atol=1e-5)

    print("KERNEL_OK")
</pallas_src>

<mosaic_0001>
module attributes {stable_mosaic.version = 11 : i64} {
  func.func @_era_kernel_rows(%arg0: i32, %arg1: memref<64x128xf32, #tpu.memory_space<vmem>>, %arg2: memref<64x1xf32, #tpu.memory_space<vmem>>, %arg3: memref<64x1xf32, #tpu.memory_space<vmem>>, %arg4: memref<6xf32, #tpu.memory_space<smem>>, %arg5: memref<4xf32, #tpu.memory_space<smem>>, %arg6: memref<64x128xf32, #tpu.memory_space<vmem>>) attributes {dimension_semantics = [#tpu.dimension_semantics<parallel>], iteration_bounds = array<i64: 1>, scalar_prefetch = 0 : i64, scratch_operands = 0 : i64, tpu.core_type = #tpu.core_type<tc>, window_params = [{transform_indices = @transform_0, window_bounds = array<i64: 64, 128>}, {pipeline_mode = #tpu.pipeline_mode<synchronous>, transform_indices = @transform_1, window_bounds = array<i64: 64, 1>}, {pipeline_mode = #tpu.pipeline_mode<synchronous>, transform_indices = @transform_2, window_bounds = array<i64: 64, 1>}, {transform_indices = @transform_3, window_bounds = array<i64: 6>}, {transform_indices = @transform_4, window_bounds = array<i64: 4>}, {transform_indices = @transform_5, window_bounds = array<i64: 64, 128>}]} {
    %c0 = arith.constant 0 : index
    %c0_0 = arith.constant 0 : index
    %0 = vector.load %arg1[%c0, %c0_0] : memref<64x128xf32, #tpu.memory_space<vmem>>, vector<64x128xf32>
    %cst = arith.constant dense<0.000000e+00> : vector<128xf32>
    %1 = vector.multi_reduction <add>, %0, %cst [0] : vector<64x128xf32> to vector<128xf32>
    %2 = vector.shape_cast %1 : vector<128xf32> to vector<1x128xf32>
    %3 = arith.mulf %0, %0 : vector<64x128xf32>
    %cst_1 = arith.constant dense<0.000000e+00> : vector<128xf32>
    %4 = vector.multi_reduction <add>, %3, %cst_1 [0] : vector<64x128xf32> to vector<128xf32>
    %5 = vector.shape_cast %4 : vector<128xf32> to vector<1x128xf32>
    %cst_2 = arith.constant 1.562500e-02 : f32
    %6 = vector.broadcast %cst_2 : f32 to vector<1x128xf32>
    %7 = arith.mulf %2, %6 : vector<1x128xf32>
    %8 = arith.mulf %2, %7 : vector<1x128xf32>
    %9 = arith.subf %5, %8 : vector<1x128xf32>
    %cst_3 = arith.constant 0.000000e+00 : f32
    %10 = vector.broadcast %cst_3 : f32 to vector<1x128xf32>
    %11 = arith.maximumf %9, %10 : vector<1x128xf32>
    %cst_4 = arith.constant 0.0158730168 : f32
    %12 = vector.broadcast %cst_4 : f32 to vector<1x128xf32>
    %13 = arith.mulf %11, %12 : vector<1x128xf32>
    %14 = math.sqrt %13 : vector<1x128xf32>
    %cst_5 = arith.constant 9.99999997E-7 : f32
    %15 = vector.broadcast %cst_5 : f32 to vector<1x128xf32>
    %16 = arith.addf %14, %15 : vector<1x128xf32>
    %cst_6 = arith.constant 1.000000e+00 : f32
    %17 = vector.broadcast %cst_6 : f32 to vector<1x128xf32>
    %18 = arith.divf %17, %16 : vector<1x128xf32>
    %c0_7 = arith.constant 0 : index
    %c0_8 = arith.constant 0 : index
    %19 = vector.load %arg2[%c0_7, %c0_8] : memref<64x1xf32, #tpu.memory_space<vmem>>, vector<64x1xf32>
    %c0_9 = arith.constant 0 : index
    %c0_10 = arith.constant 0 : index
    %20 = vector.load %arg3[%c0_9, %c0_10] : memref<64x1xf32, #tpu.memory_space<vmem>>, vector<64x1xf32>
    %21 = vector.broadcast %7 : vector<1x128xf32> to vector<64x128xf32>
    %22 = arith.subf %0, %21 : vector<64x128xf32>
    %23 = vector.broadcast %18 : vector<1x128xf32> to vector<64x128xf32>
    %24 = arith.mulf %22, %23 : vector<64x128xf32>
    %25 = vector.broadcast %20 : vector<64x1xf32> to vector<64x128xf32>
    %26 = arith.mulf %25, %24 : vector<64x128xf32>
    %27 = vector.broadcast %19 : vector<64x1xf32> to vector<64x128xf32>
    %28 = arith.addf %27, %26 : vector<64x128xf32>
    %c0_11 = arith.constant 0 : index
    %29 = memref.load %arg4[%c0_11] : memref<6xf32, #tpu.memory_space<smem>>
    %30 = vector.broadcast %29 : f32 to vector<64x128xf32>
    %31 = arith.mulf %30, %28 : vector<64x128xf32>
    %c1 = arith.constant 1 : index
    %32 = memref.load %arg4[%c1] : memref<6xf32, #tpu.memory_space<smem>>
    %33 = vector.broadcast %32 : f32 to vector<64x128xf32>
    %34 = arith.addf %31, %33 : vector<64x128xf32>
    %c2 = arith.constant 2 : index
    %35 = memref.load %arg4[%c2] : memref<6xf32, #tpu.memory_space<smem>>
    %c3 = arith.constant 3 : index
    %36 = memref.load %arg4[%c3] : memref<6xf32, #tpu.memory_space<smem>>
    %c0_12 = arith.constant 0 : index
    %37 = memref.load %arg5[%c0_12] : memref<4xf32, #tpu.memory_space<smem>>
    %c1_13 = arith.constant 1 : index
    %38 = memref.load %arg5[%c1_13] : memref<4xf32, #tpu.memory_space<smem>>
    %39 = vector.broadcast %37 : f32 to vector<64x128xf32>
    %40 = arith.subf %28, %39 : vector<64x128xf32>
    %41 = arith.mulf %40, %40 : vector<64x128xf32>
    %42 = arith.mulf %38, %38 : f32
    %cst_14 = arith.constant 9.99999997E-7 : f32
    %43 = arith.addf %42, %cst_14 : f32
    %44 = vector.broadcast %43 : f32 to vector<64x128xf32>
    %45 = arith.addf %41, %44 : vector<64x128xf32>
    %46 = tpu.reciprocal %45 {approx = true} : vector<64x128xf32> -> vector<64x128xf32>
    %47 = arith.mulf %45, %46 : vector<64x128xf32>
    %cst_15 = arith.constant 2.000000e+00 : f32
    %48 = vector.broadcast %cst_15 : f32 to vector<64x128xf32>
    %49 = arith.subf %48, %47 : vector<64x128xf32>
    %50 = arith.mulf %46, %49 : vector<64x128xf32>
    %51 = vector.broadcast %35 : f32 to vector<64x128xf32>
    %52 = arith.mulf %51, %28 : vector<64x128xf32>
    %53 = vector.broadcast %36 : f32 to vector<64x128xf32>
    %54 = arith.addf %52, %53 : vector<64x128xf32>
    %55 = arith.mulf %54, %50 : vector<64x128xf32>
    %56 = arith.addf %34, %55 : vector<64x128xf32>
    %c4 = arith.constant 4 : index
    %57 = memref.load %arg4[%c4] : memref<6xf32, #tpu.memory_space<smem>>
    %c5 = arith.constant 5 : index
    %58 = memref.load %arg4[%c5] : memref<6xf32, #tpu.memory_space<smem>>
    %c2_16 = arith.constant 2 : index
    %59 = memref.load %arg5[%c2_16] : memref<4xf32, #tpu.memory_space<smem>>
    %c3_17 = arith.constant 3 : index
    %60 = memref.load %arg5[%c3_17] : memref<4xf32, #tpu.memory_space<smem>>
    %61 = vector.broadcast %59 : f32 to vector<64x128xf32>
    %62 = arith.subf %28, %61 : vector<64x128xf32>
    %63 = arith.mulf %62, %62 : vector<64x128xf32>
    %64 = arith.mulf %60, %60 : f32
    %cst_18 = arith.constant 9.99999997E-7 : f32
    %65 = arith.addf %64, %cst_18 : f32
    %66 = vector.broadcast %65 : f32 to vector<64x128xf32>
    %67 = arith.addf %63, %66 : vector<64x128xf32>
    %68 = tpu.reciprocal %67 {approx = true} : vector<64x128xf32> -> vector<64x128xf32>
    %69 = arith.mulf %67, %68 : vector<64x128xf32>
    %cst_19 = arith.constant 2.000000e+00 : f32
    %70 = vector.broadcast %cst_19 : f32 to vector<64x128xf32>
    %71 = arith.subf %70, %69 : vector<64x128xf32>
    %72 = arith.mulf %68, %71 : vector<64x128xf32>
    %73 = vector.broadcast %57 : f32 to vector<64x128xf32>
    %74 = arith.mulf %73, %28 : vector<64x128xf32>
    %75 = vector.broadcast %58 : f32 to vector<64x128xf32>
    %76 = arith.addf %74, %75 : vector<64x128xf32>
    %77 = arith.mulf %76, %72 : vector<64x128xf32>
    %78 = arith.addf %56, %77 : vector<64x128xf32>
    %c0_20 = arith.constant 0 : index
    %c0_21 = arith.constant 0 : index
    %79 = vector.load %arg6[%c0_20, %c0_21] : memref<64x128xf32, #tpu.memory_space<vmem>>, vector<64x128xf32>
    tpu.vector_store %arg6[%c0_20, %c0_21], %78 {strides = array<i32>} : memref<64x128xf32, #tpu.memory_space<vmem>>, vector<64x128xf32>,
    return
  }
  func.func @transform_0(%arg0: i32) -> (i32, i32) {
    %c0_i32 = arith.constant 0 : i32
    %c0_i32_0 = arith.constant 0 : i32
    return %c0_i32, %arg0 : i32, i32
  }
  func.func @transform_1(%arg0: i32) -> (i32, i32) {
    %c0_i32 = arith.constant 0 : i32
    %c0_i32_0 = arith.constant 0 : i32
    %c0_i32_1 = arith.constant 0 : i32
    return %c0_i32, %c0_i32_0 : i32, i32
  }
  func.func @transform_2(%arg0: i32) -> (i32, i32) {
    %c0_i32 = arith.constant 0 : i32
    %c0_i32_0 = arith.constant 0 : i32
    %c0_i32_1 = arith.constant 0 : i32
    return %c0_i32, %c0_i32_0 : i32, i32
  }
  func.func @transform_3(%arg0: i32) -> i32 {
    %c0_i32 = arith.constant 0 : i32
    %c0_i32_0 = arith.constant 0 : i32
    return %c0_i32 : i32
  }
  func.func @transform_4(%arg0: i32) -> i32 {
    %c0_i32 = arith.constant 0 : i32
    %c0_i32_0 = arith.constant 0 : i32
    return %c0_i32 : i32
  }
  func.func @transform_5(%arg0: i32) -> (i32, i32) {
    %c0_i32 = arith.constant 0 : i32
    %c0_i32_0 = arith.constant 0 : i32
    return %c0_i32, %arg0 : i32, i32
  }
}

</mosaic_0001>

<bundles_post_ra>
// kernel: tpu_custom_call.1
= control target key start
LH: loop header
LB: loop body
LE: loop exit
PB: predicated region body
PF: predicated region fallthrough
CT: control target
= control target key end

     0   :  { %10 = vsyncpa [#allocation4], 0  ;;  %s948_s0 = inlined_call_operand.vmem [shape: f32[64,128], index: 0, kind: input, shape index: {}]   ;;  %s949_s1 = inlined_call_operand.vmem [shape: f32[64,1], index: 1, kind: input, shape index: {}]   ;;  %s950_s2 = inlined_call_operand.vmem [shape: f32[64,1], index: 2, kind: input, shape index: {}]   ;;  %s951_s3 = inlined_call_operand.vmem [shape: f32[6], index: 3, kind: input, shape index: {}]   ;;  %s952_s4 = inlined_call_operand.vmem [shape: f32[4], index: 4, kind: input, shape index: {}]   ;;  %s953_s5 = inlined_call_operand.hbm [shape: f32[64,128], index: 5, kind: output, shape index: {}]  }
   0x1   :  { %11 = vsyncpa [#allocation6], 0 }
   0x2   :  { %12 = vsyncpa [#allocation3], 0  ;;  %s24_s20 = sshll.u32 %s951_s3, 4  ;;  %s33_s23 = sshll.u32 %s952_s4, 4  ;;  %s25_s20 = int_to_ptr.vmem [resolvable:$true] %s24_s20  ;;  %s34_s23 = int_to_ptr.vmem [resolvable:$true] %s33_s23 }
   0x3   :  { %s600_s24 = smov [#allocation2]   ;;  %s601_s25 = smov [#allocation5]  }
   0x4   :  { %27 = dma.vmem_to_smem %s25_s20, 16, %s600_s24, [#allocation4]  }
   0x5   :  { %36 = dma.vmem_to_smem %s34_s23, 16, %s601_s25, [#allocation6]  }
   0x6   :  { %594 = dma.done.wait [#allocation4], 16  }
   0x7   :  { %595 = vsyncadd [#allocation4], 4294967280 }
   0x8   :  { %596 = dma.done.wait [#allocation6], 16  }
   0x9   :  { %597 = vsyncadd [#allocation6], 4294967280 }
   0xa   :  { %45 = sfence }
   0xb   :  { %v133_v0 = vld [vmem:[%s950_s2 + $0x20] sm:$0xff]  ;;  %v131_v1 = vld [vmem:[%s950_s2 + $0x10] sm:$0xff]  ;;  %v602_v3 = vmov 0   ;;  %v134_v4 = vld [vmem:[%s950_s2 + $0x28] sm:$0xff]  ;;  %s500_s18 = sld [smem:[#allocation5 + $0x3]]  ;;  %s479_s7 = sshll.u32 %s953_s5, 4  ;;  %s480_s7 = int_to_ptr.hbm [resolvable:$true] %s479_s7 }
   0xc   :  { %v129_v2 = vld [vmem:[%s950_s2] sm:$0xff]  ;;  %509 = vset.pattern.permute.xlu2 %v602_v3  ;;  %508 = vset.pattern.permute.xlu1 %v602_v3  ;;  %v662_v6 = vld [vmem:[%s948_s0 + $0x8] sm:$0xff]  ;;  %v132_v7 = vld [vmem:[%s950_s2 + $0x18] sm:$0xff]  ;;  %s271_s19 = sld [smem:[#allocation5]]  ;;  %s604_s8 = smov 128  }
   0xd   :  { %507 = vset.pattern.permute.xlu0 %v602_v3  ;;  %175 = vperm.xlu2 %509, %v133_v0   ;;  %v657_v5 = vld [vmem:[%s948_s0] sm:$0xff]  ;;  %v130_v8 = vld [vmem:[%s950_s2 + $0x8] sm:$0xff]  ;;  %v675_v10 = vld [vmem:[%s948_s0 + $0x10] sm:$0xff]  ;;  %v68_v13 = vmul.f32 %v662_v6, %v662_v6  ;;  %s499_s20 = sld [smem:[#allocation5 + $0x2]] }
   0xe   :  { %165 = vperm.xlu1 %508, %v131_v1   ;;  %155 = vperm.xlu0 %507, %v129_v2   ;;  %v54_v9 = vadd.f32 %v662_v6, %v657_v5  ;;  %v67_v12 = vmul.f32 %v657_v5, %v657_v5  ;;  %v685_v14 = vld [vmem:[%s948_s0 + $0x18] sm:$0xff]  ;;  %v69_v16 = vmul.f32 %v675_v10, %v675_v10  ;;  %v693_v18 = vld [vmem:[%s948_s0 + $0x20] sm:$0xff]  ;;  %v704_v23 = vld [vmem:[%s948_s0 + $0x28] sm:$0xff]  ;;  %s249_s25 = sld [smem:[#allocation2]] }
   0xf   :  { %v70_v20 = vmul.f32 %v685_v14, %v685_v14  ;;  %v121_v22 = vld [vmem:[%s949_s1] sm:$0xff]  ;;  %v136_v24 = vld [vmem:[%s950_s2 + $0x38] sm:$0xff]  ;;  %v135_v25 = vld [vmem:[%s950_s2 + $0x30] sm:$0xff]  ;;  %v71_v27 = vmul.f32 %v693_v18, %v693_v18  ;;  %v72_v31 = vmul.f32 %v704_v23, %v704_v23  ;;  %s493_s26 = sld [smem:[#allocation2 + $0x1]]  ;;  %s603_s2 = smov [#allocation7]  }
  0x10   :  { %v55_v11 = vadd.f32 %v54_v9, %v675_v10  ;;  %v75_v17 = vadd.f32 %v68_v13, %v67_v12  ;;  %v718_v29 = vld [vmem:[%s948_s0 + $0x30] sm:$0xff]  ;;  %v726_v33 = vld [vmem:[%s948_s0 + $0x38] sm:$0xff]  ;;  %v122_v42 = vld [vmem:[%s949_s1 + $0x8] sm:$0xff]  ;;  %s494_s27 = sld [smem:[#allocation2 + $0x2]]  ;;  %s477_s4 = sshll.u32 %s603_s2, 4  ;;  %s478_s4 = int_to_ptr.vmem [resolvable:$true] %s477_s4 }
  0x11   :  { %v73_v35 = vmul.f32 %v718_v29, %v718_v29  ;;  %v74_v38 = vmul.f32 %v726_v33, %v726_v33  ;;  %v124_v40 = vld [vmem:[%s949_s1 + $0x18] sm:$0xff]  ;;  %v123_v41 = vld [vmem:[%s949_s1 + $0x10] sm:$0xff]  ;;  %v126_v52 = vld [vmem:[%s949_s1 + $0x28] sm:$0xff]  ;;  %s388_s22 = smul.f32 %s500_s18, %s500_s18  ;;  %s497_s3 = sld [smem:[#allocation2 + $0x4]] }
  0x12   :  { %v56_v15 = vadd.f32 %v55_v11, %v685_v14  ;;  %v76_v21 = vadd.f32 %v75_v17, %v69_v16  ;;  %v127_v51 = vld [vmem:[%s949_s1 + $0x30] sm:$0xff]  ;;  %v125_v53 = vld [vmem:[%s949_s1 + $0x20] sm:$0xff]  ;;  %v128_v61 = vld [vmem:[%s949_s1 + $0x38] sm:$0xff]  ;;  %s496_s1 = sld [smem:[#allocation5 + $0x1]]  ;;  %s605_s0 = smov 8  }
  0x13   :  { %s389_s24 = sadd.f32 1e-06, %s388_s22 }
  0x14   :  { %v57_v19 = vadd.f32 %v56_v15, %v693_v18  ;;  %v77_v28 = vadd.f32 %v76_v21, %v70_v20  ;;  %s495_s28 = sld [smem:[#allocation2 + $0x3]] }
  0x15   :  { %180 = vperm.xlu2 %509, %v134_v4   ;;  %s789_s29 = sld [smem:[#allocation2 + $0x5]] }
  0x16   :  { %170 = vperm.xlu1 %508, %v132_v7   ;;  %160 = vperm.xlu0 %507, %v130_v8   ;;  %v58_v26 = vadd.f32 %v57_v19, %v704_v23  ;;  %v78_v32 = vadd.f32 %v77_v28, %v71_v27 }
  0x18   :  { %v59_v30 = vadd.f32 %v58_v26, %v718_v29  ;;  %v79_v36 = vadd.f32 %v78_v32, %v72_v31  ;;  %s290_s21 = smul.f32 %s496_s1, %s496_s1 }
  0x1a   :  { %v60_v34 = vadd.f32 %v59_v30, %v726_v33  ;;  %v80_v39 = vadd.f32 %v79_v36, %v73_v35  ;;  %s291_s23 = sadd.f32 1e-06, %s290_s21 }
  0x1c   :  { %v61_v37 = vrot.slane %v60_v34, 4  ;;  %v81_v44 = vadd.f32 %v80_v39, %v74_v38 }
  0x1d   :  { %203 = vperm.xlu2 %509, %v121_v22  }
  0x1e   :  { %190 = vperm.xlu1 %508, %v136_v24   ;;  %185 = vperm.xlu0 %507, %v135_v25   ;;  %v62_v43 = vadd.f32 %v61_v37, %v60_v34  ;;  %v82_v46 = vrot.slane %v81_v44, 4 }
  0x20   :  { %v63_v45 = vrot.slane %v62_v43, 2  ;;  %v83_v48 = vadd.f32 %v82_v46, %v81_v44  ;;  %v783_v46 = vstv %s389_s24 }
  0x22   :  { %v64_v47 = vadd.f32 %v63_v45, %v62_v43  ;;  %v84_v50 = vrot.slane %v83_v48, 2  ;;  %v781_v45 = vstv %s291_s23 }
  0x24   :  { %v65_v49 = vrot.slane %v64_v47, 1  ;;  %v85_v55 = vadd.f32 %v84_v50, %v83_v48 }
  0x25   :  { %218 = vperm.xlu2 %509, %v124_v40   ;;  %v774_v40 = vstv %s271_s19 }
  0x26   :  { %213 = vperm.xlu1 %508, %v123_v41   ;;  %208 = vperm.xlu0 %507, %v122_v42   ;;  %v66_v54 = vadd.f32 %v65_v49, %v64_v47  ;;  %v86_v56 = vrot.slane %v85_v55, 1  ;;  %v776_v41 = vstv %s499_s20 }
  0x28   :  { %v751_v57 = vmul.f32 0.015625, %v66_v54  ;;  %v87_v58 = vadd.f32 %v86_v56, %v85_v55 }
  0x2a   :  { %v89_v59 = vmul.f32 %v751_v57, %v66_v54  ;;  %v141_v4 = vsub.f32 %v693_v18, %v751_v57  ;;  %v142_v9 = vsub.f32 %v704_v23, %v751_v57  ;;  %v137_v31 = vsub.f32 %v657_v5, %v751_v57 }
  0x2b   :  { %v140_v39 = vsub.f32 %v685_v14, %v751_v57  ;;  %v143_v54 = vsub.f32 %v718_v29, %v751_v57  ;;  %v139_v56 = vsub.f32 %v675_v10, %v751_v57 }
  0x2c   :  { %v90_v60 = vsub.f32 %v87_v58, %v89_v59 }
  0x2d   :  { %233 = vperm.xlu2 %509, %v127_v51  }
  0x2e   :  { %228 = vperm.xlu1 %508, %v126_v52   ;;  %223 = vperm.xlu0 %507, %v125_v53   ;;  %v91_v62 = vmax.f32 %v90_v60, 0.0 }
  0x30   :  { %v92_v63 = vmul.f32 0.015873017, %v91_v62  ;;  %v802_v62 = vstv %s494_s27 }
  0x32   :  { %510 = vrsqrt.f32 %v92_v63  ;;  %vm100_vm0 = vcmp.eq.f32.partialorder %v92_v63, inf  ;;  %v103_v12 = vand.u32 2147483648, %v92_v63  ;;  %vm102_vm1 = vcmp.eq.f32.partialorder %v92_v63, 0.0 }
  0x36   :  { %238 = vperm.xlu0 %507, %v128_v61   ;;  %v800_v61 = vstv %s249_s25 }
  0x38   :  { %v511_v0 = vpop.eup %510 }
  0x39   :  { %v94_v1 = vmul.f32 %v511_v0, %v92_v63 }
  0x3b   :  { %v95_v2 = vmul.f32 %v511_v0, %v94_v1  ;;  %v808_v1 = vstv %s493_s26 }
  0x3d   :  { %v96_v3 = vmul.f32 0.5, %v95_v2  ;;  %v810_v2 = vstv %s497_s3 }
  0x3f   :  { %v97_v7 = vsub.f32 1.5, %v96_v3  ;;  %v138_v3 = vsub.f32 %v662_v6, %v751_v57 }
  0x41   :  { %v98_v8 = vmul.f32 %v511_v0, %v97_v7 }
  0x43   :  { %v99_v11 = vmul.f32 %v98_v8, %v92_v63 }
  0x45   :  { %v101_v13 = vsel %vm100_vm0, %v92_v63, %v99_v11 }
  0x46   :  { %v104_v15 = vsel %vm102_vm1, %v103_v12, %v101_v13  ;;  %v819_v13 = vstv %s495_s28 }
  0x47   :  { %v105_v16 = vadd.f32 1e-06, %v104_v15 }
  0x49   :  { %512 = vrcp.f32 %v105_v16  ;;  %vm111_vm2 = vweird.f32 %v105_v16  ;;  %v117_v24 = vand.u32 2147483648, %v105_v16  ;;  %v115_v26 = vand.u32 2147483647, %v105_v16 }
  0x4b   :  { %v118_v28 = vor.u32 1.1754944e-38, %v117_v24  ;;  %vm116_vm5 = vcmp.eq.f32.partialorder %v115_v26, 8.507059e+37  ;;  %v825_v24 = vstv %s789_s29 }
  0x4f   :  { %v513_v17 = vpop.eup %512 }
  0x50   :  { %v107_v19 = vmul.f32 %v513_v17, %v105_v16  ;;  %vm112_vm3 = vweird.f32 %v513_v17 }
  0x51   :  { %vm113_vm4 = vmor %vm111_vm2, %vm112_vm3 }
  0x52   :  { %v108_v21 = vsub.f32 1.0, %v107_v19 }
  0x54   :  { %v109_v22 = vmul.f32 %v513_v17, %v108_v21 }
  0x56   :  { %v110_v25 = vadd.f32 %v513_v17, %v109_v22 }
  0x58   :  { %v114_v30 = vsel %vm113_vm4, %v513_v17, %v110_v25 }
  0x59   :  { %v767_v32 = vsel %vm116_vm5, %v118_v28, %v114_v30 }
  0x5a   :  { %v145_v35 = vmul.f32 %v137_v31, %v767_v32  ;;  %v148_v44 = vmul.f32 %v140_v39, %v767_v32  ;;  %v151_v60 = vmul.f32 %v143_v54, %v767_v32  ;;  %v149_v29 = vmul.f32 %v141_v4, %v767_v32 }
  0x5b   :  { %v150_v10 = vmul.f32 %v142_v9, %v767_v32  ;;  %v147_v8 = vmul.f32 %v139_v56, %v767_v32  ;;  %v146_v26 = vmul.f32 %v138_v3, %v767_v32  ;;  %v144_v31 = vsub.f32 %v726_v33, %v751_v57 }
  0x67   :  { %v761_v20 = vpop.permute.xlu2 %175 }
  0x68   :  { %v829_v28 = vmul.f32 %v761_v20, %v149_v29 }
  0x6f   :  { %v763_v27 = vpop.permute.xlu2 %180 }
  0x77   :  { %v204_v34 = vpop.permute.xlu2 %203 }
  0x7f   :  { %v219_v48 = vpop.permute.xlu2 %218 }
  0x80   :  { %v770_v36 = vpop.permute.xlu1 %165  ;;  %v156_v37 = vpop.permute.xlu0 %155 }
  0x81   :  { %v193_v38 = vmul.f32 %v156_v37, %v145_v35  ;;  %v195_v35 = vmul.f32 %v770_v36, %v147_v8 }
  0x83   :  { %v241_v5 = vadd.f32 %v204_v34, %v193_v38 }
  0x85   :  { %v274_v42 = vsub.f32 %v241_v5, %v774_v40  ;;  %v372_v43 = vsub.f32 %v241_v5, %v776_v41  ;;  %v251_v15 = vmul.f32 %v800_v61, %v241_v5  ;;  %v334_v6 = vmul.f32 %v802_v62, %v241_v5 }
  0x86   :  { %v432_v21 = vmul.f32 %v810_v2, %v241_v5 }
  0x87   :  { %v282_v14 = vmul.f32 %v274_v42, %v274_v42  ;;  %v380_v47 = vmul.f32 %v372_v43, %v372_v43  ;;  %v234_v17 = vpop.permute.xlu2 %233  ;;  %v343_v38 = vadd.f32 %v819_v13, %v334_v6  ;;  %v261_v5 = vadd.f32 %v808_v1, %v251_v15 }
  0x88   :  { %v171_v49 = vpop.permute.xlu1 %170  ;;  %v161_v50 = vpop.permute.xlu0 %160  ;;  %v441_v43 = vadd.f32 %v825_v24, %v432_v21 }
  0x89   :  { %v293_v51 = vadd.f32 %v781_v45, %v282_v14  ;;  %v391_v52 = vadd.f32 %v783_v46, %v380_v47  ;;  %v196_v53 = vmul.f32 %v171_v49, %v148_v44  ;;  %v194_v47 = vmul.f32 %v161_v50, %v146_v26 }
  0x8b   :  { %514 = vrcp.f32 %v293_v51  ;;  %v244_v55 = vadd.f32 %v219_v48, %v196_v53 }
  0x8c   :  { %516 = vrcp.f32 %v391_v52 }
  0x8d   :  { %v277_v58 = vsub.f32 %v244_v55, %v774_v40  ;;  %v375_v59 = vsub.f32 %v244_v55, %v776_v41  ;;  %v254_v14 = vmul.f32 %v800_v61, %v244_v55  ;;  %v337_v36 = vmul.f32 %v802_v62, %v244_v55 }
  0x8f   :  { %v285_v63 = vmul.f32 %v277_v58, %v277_v58  ;;  %v383_v0 = vmul.f32 %v375_v59, %v375_v59 }
  0x90   :  { %v814_v18 = vpop.permute.xlu1 %190  ;;  %v186_v4 = vpop.permute.xlu0 %185 }
  0x91   :  { %v515_v7 = vpop.eup %514  ;;  %v296_v11 = vadd.f32 %v781_v45, %v285_v63  ;;  %v394_v12 = vadd.f32 %v783_v46, %v383_v0  ;;  %v199_v23 = vmul.f32 %v186_v4, %v151_v60  ;;  %v198_v0 = vmul.f32 %v763_v27, %v150_v10 }
  0x92   :  { %v517_v9 = vpop.eup %516  ;;  %v309_v16 = vmul.f32 %v515_v7, %v293_v51  ;;  %v435_v51 = vmul.f32 %v810_v2, %v244_v55 }
  0x93   :  { %v407_v19 = vmul.f32 %v517_v9, %v391_v52  ;;  %518 = vrcp.f32 %v296_v11  ;;  %v247_v22 = vadd.f32 %v234_v17, %v199_v23 }
  0x94   :  { %v317_v25 = vsub.f32 2.0, %v309_v16  ;;  %520 = vrcp.f32 %v394_v12  ;;  %v444_v15 = vadd.f32 %v825_v24, %v435_v51 }
  0x95   :  { %v415_v30 = vsub.f32 2.0, %v407_v19  ;;  %v280_v34 = vsub.f32 %v247_v22, %v774_v40  ;;  %v378_v39 = vsub.f32 %v247_v22, %v776_v41  ;;  %v257_v17 = vmul.f32 %v800_v61, %v247_v22 }
  0x96   :  { %v325_v37 = vmul.f32 %v515_v7, %v317_v25  ;;  %v852_v7 = vmul.f32 %v144_v31, %v767_v32  ;;  %v340_v19 = vmul.f32 %v802_v62, %v247_v22  ;;  %v438_v21 = vmul.f32 %v810_v2, %v247_v22 }
  0x97   :  { %v423_v42 = vmul.f32 %v517_v9, %v415_v30  ;;  %v288_v20 = vmul.f32 %v280_v34, %v280_v34  ;;  %v386_v33 = vmul.f32 %v378_v39, %v378_v39  ;;  %v346_v9 = vadd.f32 %v819_v13, %v337_v36 }
  0x98   :  { %v351_v44 = vmul.f32 %v343_v38, %v325_v37  ;;  %v214_v57 = vpop.permute.xlu1 %213  ;;  %v209_v48 = vpop.permute.xlu0 %208  ;;  %v447_v51 = vadd.f32 %v825_v24, %v438_v21 }
  0x99   :  { %v519_v49 = vpop.eup %518  ;;  %v299_v52 = vadd.f32 %v781_v45, %v288_v20  ;;  %v843_v53 = vadd.f32 %v214_v57, %v195_v35  ;;  %v449_v58 = vmul.f32 %v441_v43, %v423_v42  ;;  %v397_v60 = vadd.f32 %v783_v46, %v386_v33 }
  0x9a   :  { %v521_v54 = vpop.eup %520  ;;  %v359_v56 = vadd.f32 %v351_v44, %v261_v5  ;;  %v312_v59 = vmul.f32 %v519_v49, %v296_v11  ;;  %v848_v63 = vadd.f32 %v209_v48, %v194_v47  ;;  %v267_v57 = vadd.f32 %v808_v1, %v257_v17 }
  0x9b   :  { %v410_v29 = vmul.f32 %v521_v54, %v394_v12  ;;  %522 = vrcp.f32 %v299_v52  ;;  %v276_v50 = vsub.f32 %v843_v53, %v774_v40  ;;  %v374_v11 = vsub.f32 %v843_v53, %v776_v41 }
  0x9c   :  { %v457_v55 = vadd.f32 %v449_v58, %v359_v56  ;;  %v320_v3 = vsub.f32 2.0, %v312_v59  ;;  %524 = vrcp.f32 %v397_v60  ;;  %v264_v12 = vadd.f32 %v808_v1, %v254_v14 }
  0x9d   :  { %v418_v4 = vsub.f32 2.0, %v410_v29  ;;  %v284_v8 = vmul.f32 %v276_v50, %v276_v50  ;;  %v382_v16 = vmul.f32 %v374_v11, %v374_v11  ;;  %v275_v32 = vsub.f32 %v848_v63, %v774_v40 }
  0x9e   :  { %465 = vst [vmem:[#allocation7] sm:$0xff] %v457_v55  ;;  %v328_v23 = vmul.f32 %v519_v49, %v320_v3  ;;  %v253_v26 = vmul.f32 %v800_v61, %v843_v53  ;;  %v373_v5 = vsub.f32 %v848_v63, %v776_v41  ;;  %v336_v22 = vmul.f32 %v802_v62, %v843_v53 }
  0x9f   :  { %v426_v27 = vmul.f32 %v521_v54, %v418_v4  ;;  %v295_v10 = vadd.f32 %v781_v45, %v284_v8  ;;  %v393_v30 = vadd.f32 %v783_v46, %v382_v16  ;;  %v283_v31 = vmul.f32 %v275_v32, %v275_v32 }
  0xa0   :  { %v354_v6 = vmul.f32 %v346_v9, %v328_v23  ;;  %v229_v34 = vpop.permute.xlu1 %228  ;;  %v381_v14 = vmul.f32 %v373_v5, %v373_v5  ;;  %v224_v33 = vpop.permute.xlu0 %223  ;;  %v349_v48 = vadd.f32 %v819_v13, %v340_v19  ;;  %v263_v59 = vadd.f32 %v808_v1, %v253_v26 }
  0xa1   :  { %v523_v25 = vpop.eup %522  ;;  %526 = vrcp.f32 %v295_v10  ;;  %v452_v38 = vmul.f32 %v444_v15, %v426_v27  ;;  %v294_v43 = vadd.f32 %v781_v45, %v283_v31  ;;  %v873_v47 = vadd.f32 %v229_v34, %v198_v0 }
  0xa2   :  { %v525_v35 = vpop.eup %524  ;;  %v362_v37 = vadd.f32 %v354_v6, %v264_v12  ;;  %v315_v39 = vmul.f32 %v523_v25, %v299_v52  ;;  %528 = vrcp.f32 %v393_v30  ;;  %v392_v52 = vadd.f32 %v783_v46, %v381_v14 }
  0xa3   :  { %v413_v42 = vmul.f32 %v525_v35, %v397_v60  ;;  %530 = vrcp.f32 %v294_v43  ;;  %v279_v54 = vsub.f32 %v873_v47, %v774_v40  ;;  %v377_v60 = vsub.f32 %v873_v47, %v776_v41 }
  0xa4   :  { %v460_v20 = vadd.f32 %v452_v38, %v362_v37  ;;  %v323_v44 = vsub.f32 2.0, %v315_v39  ;;  %v885_v29 = vadd.f32 %v224_v33, %v829_v28  ;;  %v345_v55 = vadd.f32 %v819_v13, %v336_v22 }
  0xa5   :  { %v421_v49 = vsub.f32 2.0, %v413_v42  ;;  %532 = vrcp.f32 %v392_v52  ;;  %v434_v4 = vmul.f32 %v810_v2, %v843_v53  ;;  %v252_v8 = vmul.f32 %v800_v61, %v848_v63 }
  0xa6   :  { %468 = vst [vmem:[#allocation7 + $0x18] sm:$0xff] %v460_v20  ;;  %v331_v36 = vmul.f32 %v523_v25, %v323_v44  ;;  %v287_v11 = vmul.f32 %v279_v54, %v279_v54  ;;  %v385_v12 = vmul.f32 %v377_v60, %v377_v60  ;;  %v278_v53 = vsub.f32 %v885_v29, %v774_v40 }
  0xa7   :  { %v527_v56 = vpop.eup %526  ;;  %v429_v58 = vmul.f32 %v525_v35, %v421_v49  ;;  %v443_v25 = vadd.f32 %v825_v24, %v434_v4  ;;  %v433_v26 = vmul.f32 %v810_v2, %v848_v63  ;;  %v200_v39 = vmul.f32 %v814_v18, %v852_v7 }
  0xa8   :  { %v357_v50 = vmul.f32 %v349_v48, %v331_v36  ;;  %v311_v0 = vmul.f32 %v527_v56, %v295_v10  ;;  %v529_v3 = vpop.eup %528  ;;  %v335_v10 = vmul.f32 %v802_v62, %v848_v63  ;;  %v298_v16 = vadd.f32 %v781_v45, %v287_v11  ;;  %v239_v38 = vpop.permute.xlu0 %238 }
  0xa9   :  { %v455_v9 = vmul.f32 %v447_v51, %v429_v58  ;;  %v409_v27 = vmul.f32 %v529_v3, %v393_v30  ;;  %v531_v28 = vpop.eup %530  ;;  %v396_v32 = vadd.f32 %v783_v46, %v385_v12  ;;  %v286_v30 = vmul.f32 %v278_v53, %v278_v53 }
  0xaa   :  { %v365_v23 = vadd.f32 %v357_v50, %v267_v57  ;;  %v319_v15 = vsub.f32 2.0, %v311_v0  ;;  %v310_v21 = vmul.f32 %v531_v28, %v294_v43  ;;  %534 = vrcp.f32 %v298_v16 }
  0xab   :  { %v417_v19 = vsub.f32 2.0, %v409_v27  ;;  %v533_v31 = vpop.eup %532  ;;  %536 = vrcp.f32 %v396_v32  ;;  %v297_v42 = vadd.f32 %v781_v45, %v286_v30  ;;  %v376_v22 = vsub.f32 %v885_v29, %v776_v41 }
  0xac   :  { %v463_v6 = vadd.f32 %v455_v9, %v365_v23  ;;  %v327_v17 = vmul.f32 %v527_v56, %v319_v15  ;;  %v318_v37 = vsub.f32 2.0, %v310_v21  ;;  %v408_v5 = vmul.f32 %v533_v31, %v392_v52 }
  0xad   :  { %v425_v35 = vmul.f32 %v529_v3, %v417_v19  ;;  %v344_v44 = vadd.f32 %v819_v13, %v335_v10  ;;  %538 = vrcp.f32 %v297_v42  ;;  %v384_v33 = vmul.f32 %v376_v22, %v376_v22 }
  0xae   :  { %471 = vst [vmem:[#allocation7 + $0x30] sm:$0xff] %v463_v6  ;;  %v353_v34 = vmul.f32 %v345_v55, %v327_v17  ;;  %v326_v20 = vmul.f32 %v531_v28, %v318_v37  ;;  %v416_v14 = vsub.f32 2.0, %v408_v5  ;;  %v907_v57 = vadd.f32 %v239_v38, %v200_v39 }
  0xaf   :  { %v451_v63 = vmul.f32 %v443_v25, %v425_v35  ;;  %v262_v49 = vadd.f32 %v808_v1, %v252_v8  ;;  %v442_v7 = vadd.f32 %v825_v24, %v433_v26  ;;  %v339_v52 = vmul.f32 %v802_v62, %v873_v47 }
  0xb0   :  { %v361_v43 = vadd.f32 %v353_v34, %v263_v59  ;;  %v352_v18 = vmul.f32 %v344_v44, %v326_v20  ;;  %v535_v36 = vpop.eup %534  ;;  %v424_v51 = vmul.f32 %v533_v31, %v416_v14  ;;  %v395_v54 = vadd.f32 %v783_v46, %v384_v33 }
  0xb1   :  { %v281_v56 = vsub.f32 %v907_v57, %v774_v40  ;;  %v537_v58 = vpop.eup %536  ;;  %v256_v60 = vmul.f32 %v800_v61, %v873_v47  ;;  %v314_v50 = vmul.f32 %v535_v36, %v298_v16  ;;  %v379_v0 = vsub.f32 %v907_v57, %v776_v41 }
  0xb2   :  { %v459_v48 = vadd.f32 %v451_v63, %v361_v43  ;;  %v360_v59 = vadd.f32 %v352_v18, %v262_v49  ;;  %v450_v55 = vmul.f32 %v442_v7, %v424_v51  ;;  %v412_v3 = vmul.f32 %v537_v58, %v396_v32 }
  0xb3   :  { %v437_v4 = vmul.f32 %v810_v2, %v873_v47  ;;  %540 = vrcp.f32 %v395_v54  ;;  %v322_v8 = vsub.f32 2.0, %v314_v50  ;;  %v289_v11 = vmul.f32 %v281_v56, %v281_v56  ;;  %v539_v40 = vpop.eup %538 }
  0xb4   :  { %467 = vst [vmem:[#allocation7 + $0x10] sm:$0xff] %v459_v48  ;;  %v387_v12 = vmul.f32 %v379_v0, %v379_v0  ;;  %v458_v23 = vadd.f32 %v450_v55, %v360_v59  ;;  %v348_v9 = vadd.f32 %v819_v13, %v339_v52  ;;  %v420_v15 = vsub.f32 2.0, %v412_v3 }
  0xb5   :  { %v338_v27 = vmul.f32 %v802_v62, %v885_v29  ;;  %v330_v28 = vmul.f32 %v535_v36, %v322_v8  ;;  %v313_v10 = vmul.f32 %v539_v40, %v297_v42  ;;  %v300_v41 = vadd.f32 %v781_v45, %v289_v11 }
  0xb6   :  { %v398_v16 = vadd.f32 %v783_v46, %v387_v12  ;;  %466 = vst [vmem:[#allocation7 + $0x8] sm:$0xff] %v458_v23  ;;  %v266_v47 = vadd.f32 %v808_v1, %v256_v60  ;;  %v428_v32 = vmul.f32 %v537_v58, %v420_v15  ;;  %v446_v53 = vadd.f32 %v825_v24, %v437_v4 }
  0xb7   :  { %v356_v6 = vmul.f32 %v348_v9, %v330_v28  ;;  %v255_v17 = vmul.f32 %v800_v61, %v885_v29  ;;  %v321_v19 = vsub.f32 2.0, %v313_v10  ;;  %542 = vrcp.f32 %v300_v41 }
  0xb8   :  { %v347_v25 = vadd.f32 %v819_v13, %v338_v27  ;;  %v436_v45 = vmul.f32 %v810_v2, %v885_v29  ;;  %544 = vrcp.f32 %v398_v16  ;;  %v454_v26 = vmul.f32 %v446_v53, %v428_v32 }
  0xb9   :  { %v541_v21 = vpop.eup %540  ;;  %v364_v46 = vadd.f32 %v356_v6, %v266_v47  ;;  %v329_v30 = vmul.f32 %v539_v40, %v321_v19  ;;  %v265_v35 = vadd.f32 %v808_v1, %v255_v17  ;;  %v341_v29 = vmul.f32 %v802_v62, %v907_v57 }
  0xba   :  { %v411_v31 = vmul.f32 %v541_v21, %v395_v54  ;;  %v445_v22 = vadd.f32 %v825_v24, %v436_v45  ;;  %v258_v14 = vmul.f32 %v800_v61, %v907_v57  ;;  %v439_v48 = vmul.f32 %v810_v2, %v907_v57 }
  0xbb   :  { %v462_v34 = vadd.f32 %v454_v26, %v364_v46  ;;  %v355_v37 = vmul.f32 %v347_v25, %v329_v30  ;;  %v350_v36 = vadd.f32 %v819_v13, %v341_v29 }
  0xbc   :  { %v419_v38 = vsub.f32 2.0, %v411_v31  ;;  %v268_v52 = vadd.f32 %v808_v1, %v258_v14  ;;  %v448_v62 = vadd.f32 %v825_v24, %v439_v48 }
  0xbd   :  { %v543_v39 = vpop.eup %542  ;;  %470 = vst [vmem:[#allocation7 + $0x28] sm:$0xff] %v462_v34  ;;  %v363_v5 = vadd.f32 %v355_v37, %v265_v35 }
  0xbe   :  { %v427_v42 = vmul.f32 %v541_v21, %v419_v38  ;;  %v545_v43 = vpop.eup %544  ;;  %v316_v63 = vmul.f32 %v543_v39, %v300_v41 }
  0xbf   :  { %v414_v44 = vmul.f32 %v545_v43, %v398_v16 }
  0xc0   :  { %v453_v20 = vmul.f32 %v445_v22, %v427_v42  ;;  %v324_v33 = vsub.f32 2.0, %v316_v63 }
  0xc1   :  { %v422_v18 = vsub.f32 2.0, %v414_v44 }
  0xc2   :  { %v461_v49 = vadd.f32 %v453_v20, %v363_v5  ;;  %v332_v7 = vmul.f32 %v543_v39, %v324_v33 }
  0xc3   :  { %v430_v51 = vmul.f32 %v545_v43, %v422_v18 }
  0xc4   :  { %469 = vst [vmem:[#allocation7 + $0x20] sm:$0xff] %v461_v49  ;;  %v358_v54 = vmul.f32 %v350_v36, %v332_v7 }
  0xc5   :  { %v456_v2 = vmul.f32 %v448_v62, %v430_v51 }
  0xc6   :  { %v366_v61 = vadd.f32 %v358_v54, %v268_v52 }
  0xc8   :  { %v464_v57 = vadd.f32 %v456_v2, %v366_v61 }
  0xca   :  { %472 = vst [vmem:[#allocation7 + $0x38] sm:$0xff] %v464_v57 }
  0xcb   :  { %485 = dma.vmem_to_hbm [thread:$0]  %s478_s4, 1024, %s480_s7, [#allocation3], %s604_s8, %s604_s8, %s605_s0  }
  0xcc   :  { %598 = dma.done.wait [#allocation3], 1024  }
  0xcd   :  { %599 = vsyncadd [#allocation3], 4294966272 }
  0xce   :  { %490 = vsyncpa [#allocation3], 1 }
  0xcf   :  { %491 = vsyncpa [#allocation4], 1 }
  0xd0   :  { %492 = vsyncpa [#allocation6], 1 }

</bundles_post_ra>
